<compile_context>
chip_gen: v5e
topology: v5e:2x2
jax: 0.10.0
libtpu: 0.0.40
codegen_flags: <defaults>
</compile_context>

<pallas_src>
import jax
import jax.numpy as jnp
from jax.experimental import pallas as pl
from jax.experimental.pallas import tpu as pltpu


def _bias_kernel(x_ref, b_ref, o_ref):
    # x_ref: (TILE_R, TILE_L) tile in VMEM; b_ref: (TILE_R, 1) per-row bias column.
    # (TILE_R, 1) + (TILE_R, TILE_L) broadcasts across lanes inside the kernel.
    o_ref[...] = x_ref[...] + b_ref[...]


def _round_up(x: int, m: int) -> int:
    return ((x + m - 1) // m) * m


def bias_add(x_nchw: jax.Array, bias_c: jax.Array, *,
             tile_rows: int = 512, tile_lanes: int = 2048) -> jax.Array:
    """x_nchw: (N, C, H, W); bias_c: (C,).  Returns x + bias broadcast over H, W."""
    N, C, H, W = x_nchw.shape
    rows, lanes = N * C, H * W

    # Zero-copy views: NCHW is already contiguous as (N*C, H*W).
    x2d = x_nchw.reshape(rows, lanes)
    # Bias as a (N*C, 1) column (tiny; N*C elements).
    b_col = jnp.tile(bias_c.reshape(C, 1).astype(x2d.dtype), (N, 1))

    # Sublane multiple depends on dtype packing: 8 for f32, 16 for bf16, 32 for int8.
    sub = 8 * max(1, 4 // x2d.dtype.itemsize)
    tile_r = min(tile_rows, _round_up(rows, sub))
    tile_l = min(tile_lanes, _round_up(lanes, 128))

    grid = (pl.cdiv(rows, tile_r), pl.cdiv(lanes, tile_l))

    out2d = pl.pallas_call(
        _bias_kernel,
        out_shape=jax.ShapeDtypeStruct((rows, lanes), x2d.dtype),
        grid_spec=pltpu.PrefetchScalarGridSpec(
            num_scalar_prefetch=0,
            grid=grid,
            in_specs=[
                pl.BlockSpec((tile_r, tile_l), lambda i, j: (i, j)),
                pl.BlockSpec((tile_r, 1), lambda i, j: (i, 0)),
            ],
            out_specs=pl.BlockSpec((tile_r, tile_l), lambda i, j: (i, j)),
        ),
        compiler_params=pltpu.CompilerParams(
            dimension_semantics=("parallel", "parallel"),
            vmem_limit_bytes=48 * 1024 * 1024,
        ),
    )(x2d, b_col)

    return out2d.reshape(N, C, H, W)


if __name__ == "__main__":
    key = jax.random.PRNGKey(0)
    kx, kb = jax.random.split(key)

    N, C, H, W = 2, 4, 16, 16
    x = jax.random.normal(kx, (N, C, H, W), dtype=jnp.float32)
    # Deterministic parameter init (mirrors nn.Parameter(bias) with bias shape (C,1,1))
    bias = jax.random.normal(kb, (C,), dtype=jnp.float32)

    out = bias_add(x, bias)
    out = jax.block_until_ready(out)

    # Reference check against plain-JAX broadcast (same semantics as torch x + bias[C,1,1])
    ref = x + bias.reshape(1, C, 1, 1)
    assert out.shape == x.shape and out.dtype == x.dtype
    assert jnp.allclose(out, ref, atol=1e-6, rtol=1e-6)

    print("KERNEL_OK")
</pallas_src>

<mosaic_0001>
module attributes {stable_mosaic.version = 11 : i64} {
  func.func @_bias_kernel(%arg0: i32, %arg1: i32, %arg2: memref<8x256xf32, #tpu.memory_space<vmem>>, %arg3: memref<8x1xf32, #tpu.memory_space<vmem>>, %arg4: memref<8x256xf32, #tpu.memory_space<vmem>>) attributes {dimension_semantics = [#tpu.dimension_semantics<parallel>, #tpu.dimension_semantics<parallel>], iteration_bounds = array<i64: 1, 1>, scalar_prefetch = 0 : i64, scratch_operands = 0 : i64, tpu.core_type = #tpu.core_type<tc>, window_params = [{transform_indices = @transform_0, window_bounds = array<i64: 8, 256>}, {transform_indices = @transform_1, window_bounds = array<i64: 8, 1>}, {transform_indices = @transform_2, window_bounds = array<i64: 8, 256>}]} {
    %c0 = arith.constant 0 : index
    %c0_0 = arith.constant 0 : index
    %0 = vector.load %arg2[%c0, %c0_0] : memref<8x256xf32, #tpu.memory_space<vmem>>, vector<8x256xf32>
    %c0_1 = arith.constant 0 : index
    %c0_2 = arith.constant 0 : index
    %1 = vector.load %arg3[%c0_1, %c0_2] : memref<8x1xf32, #tpu.memory_space<vmem>>, vector<8x1xf32>
    %2 = vector.broadcast %1 : vector<8x1xf32> to vector<8x256xf32>
    %3 = arith.addf %0, %2 : vector<8x256xf32>
    %c0_3 = arith.constant 0 : index
    %c0_4 = arith.constant 0 : index
    %4 = vector.load %arg4[%c0_3, %c0_4] : memref<8x256xf32, #tpu.memory_space<vmem>>, vector<8x256xf32>
    tpu.vector_store %arg4[%c0_3, %c0_4], %3 {strides = array<i32>} : memref<8x256xf32, #tpu.memory_space<vmem>>, vector<8x256xf32>,
    return
  }
  func.func @transform_0(%arg0: i32, %arg1: i32) -> (i32, i32) {
    %c0_i32 = arith.constant 0 : i32
    return %arg0, %arg1 : i32, i32
  }
  func.func @transform_1(%arg0: i32, %arg1: i32) -> (i32, i32) {
    %c0_i32 = arith.constant 0 : i32
    %c0_i32_0 = arith.constant 0 : i32
    return %arg0, %c0_i32 : i32, i32
  }
  func.func @transform_2(%arg0: i32, %arg1: i32) -> (i32, i32) {
    %c0_i32 = arith.constant 0 : i32
    return %arg0, %arg1 : i32, i32
  }
}

</mosaic_0001>

<bundles_post_ra>
// kernel: tpu_custom_call.1
= control target key start
LH: loop header
LB: loop body
LE: loop exit
PB: predicated region body
PF: predicated region fallthrough
CT: control target
= control target key end

     0   :  { %7 = vsyncpa [#allocation3], 0  ;;  %s138_s0 = inlined_call_operand.hbm [shape: f32[8,256], index: 0, kind: input, shape index: {}]   ;;  %s139_s1 = inlined_call_operand.vmem [shape: f32[8,1], index: 1, kind: input, shape index: {}]   ;;  %s140_s2 = inlined_call_operand.hbm [shape: f32[8,256], index: 2, kind: output, shape index: {}]  }
   0x1   :  { %8 = vsyncpa [#allocation4], 0  ;;  %s14_s11 = sshll.u32 %s138_s0, 4  ;;  %s111_s12 = smov [#allocation2]   ;;  %s15_s11 = int_to_ptr.hbm [resolvable:$true] %s14_s11 }
   0x2   :  { %s16_s13 = sshll.u32 %s111_s12, 4  ;;  %s17_s13 = int_to_ptr.vmem [resolvable:$true] %s16_s13 }
   0x3   :  { %19 = dma.hbm_to_vmem [thread:$0]  %s15_s11, 256, %s17_s13, [#allocation3]  }
   0x4   :  { %107 = dma.done.wait [#allocation3], 256  }
   0x5   :  { %108 = vsyncadd [#allocation3], 4294967040  ;;  %v112_v0 = vmov 0   ;;  %v28_v1 = vld [vmem:[%s139_s1] sm:$0xff]  ;;  %v27_v3 = vld [vmem:[#allocation2 + $0x8] sm:$0xff]  ;;  %s113_s16 = smov [#allocation5]  }
   0x6   :  { %58 = vset.pattern.permute.xlu0 %v112_v0  ;;  %v26_v2 = vld [vmem:[#allocation2] sm:$0xff]  ;;  %s43_s17 = sshll.u32 %s113_s16, 4  ;;  %s45_s19 = sshll.u32 %s140_s2, 4  ;;  %s44_s17 = int_to_ptr.vmem [resolvable:$true] %s43_s17  ;;  %s46_s19 = int_to_ptr.hbm [resolvable:$true] %s45_s19 }
   0x7   :  { %31 = vperm.xlu0 %58, %v28_v1  }
  0x79   :  { %v32_v4 = vpop.permute.xlu0 %31 }
  0x7a   :  { %v34_v5 = vadd.f32 %v32_v4, %v26_v2  ;;  %v35_v6 = vadd.f32 %v32_v4, %v27_v3 }
  0x7c   :  { %36 = vst [vmem:[#allocation5] sm:$0xff] %v34_v5 }
  0x7d   :  { %37 = vst [vmem:[#allocation5 + $0x8] sm:$0xff] %v35_v6 }
  0x7e   :  { %48 = dma.vmem_to_hbm [thread:$0]  %s44_s17, 256, %s46_s19, [#allocation4]  }
  0x7f   :  { %109 = dma.done.wait [#allocation4], 256  }
  0x80   :  { %110 = vsyncadd [#allocation4], 4294967040 }
  0x81   :  { %53 = vsyncpa [#allocation3], 1 }
  0x82   :  { %54 = vsyncpa [#allocation4], 1 }

</bundles_post_ra>
